<compile_context>
chip_gen: v7x
topology: tpu7x:2x2x1
jax: 0.10.0
libtpu: 0.0.40
codegen_flags: <defaults>
</compile_context>

<pallas_src>
import functools

import jax
import jax.numpy as jnp
from jax import lax
from jax.experimental import pallas as pl
from jax.experimental.pallas import tpu as pltpu


def _round_up(a, m):
    return ((a + m - 1) // m) * m


def _warp_kernel(x_ref, flo_ref, o_ref, *, C, H, HP, W, TN, mxu_dtype):
    """x_ref: (C*HP, W); flo_ref: (2, TN); o_ref: (C, TN)."""
    f32 = jnp.float32

    # Flattened output-pixel indices covered by this lane-dense tile.
    lane = lax.broadcasted_iota(jnp.int32, (1, TN), 1)
    p = (pl.program_id(1) * TN + lane).astype(f32)
    gy = jnp.floor(p / float(W))          # exact for these magnitudes
    gx = p - gy * float(W)

    flo = flo_ref[...].astype(f32)        # (2, TN)
    vx = gx + flo[0:1, :]
    vy = gy + flo[1:2, :]

    # Normalization exactly as in the torch module, then grid_sample's
    # (bilinear, padding_mode='zeros', align_corners=False) un-normalization.
    nx = 2.0 * vx / max(W - 1, 1) - 1.0
    ny = 2.0 * vy / max(H - 1, 1) - 1.0
    ix = ((nx + 1.0) * W - 1.0) * 0.5
    iy = ((ny + 1.0) * H - 1.0) * 0.5

    x0f = jnp.floor(ix)
    y0f = jnp.floor(iy)
    wx1 = ix - x0f
    wx0 = 1.0 - wx1
    wy1 = iy - y0f
    wy0 = 1.0 - wy1
    x1f = x0f + 1.0
    y1f = y0f + 1.0

    # Fold the zero-padding (out-of-bounds) masks into the (1, TN) weight rows.
    wx0 = jnp.where((x0f >= 0.0) & (x0f <= W - 1.0), wx0, 0.0)
    wx1 = jnp.where((x1f >= 0.0) & (x1f <= W - 1.0), wx1, 0.0)
    wy0 = jnp.where((y0f >= 0.0) & (y0f <= H - 1.0), wy0, 0.0)
    wy1 = jnp.where((y1f >= 0.0) & (y1f <= H - 1.0), wy1, 0.0)

    ix0 = x0f.astype(jnp.int32)
    iy0 = y0f.astype(jnp.int32)
    ix1 = ix0 + 1
    iy1 = iy0 + 1

    # Separable bilinear gather.  Matrices are built in f32 (v5e has no bf16
    # VALU) with nested, mutually exclusive selects (ix1 = ix0 + 1) and cast
    # once before the MXU contraction.
    col = lax.broadcasted_iota(jnp.int32, (W, TN), 0)
    mx = jnp.where(col == ix0, wx0, jnp.where(col == ix1, wx1, 0.0))   # (W, TN)
    row = lax.broadcasted_iota(jnp.int32, (HP, TN), 0)
    my = jnp.where(row == iy0, wy0, jnp.where(row == iy1, wy1, 0.0))   # (HP, TN)

    xin = x_ref[...]                                        # (C*HP, W), mxu dtype
    tmp = jnp.dot(xin, mx.astype(mxu_dtype),
                  preferred_element_type=f32)               # (C*HP, TN) f32
    out = jnp.sum(tmp.reshape(C, HP, TN) * my[None, :, :], axis=1)     # (C, TN)
    o_ref[...] = out.astype(o_ref.dtype)


def _vmem_limit_bytes():
    # Raise the scoped-VMEM limit with headroom below physical capacity
    # (v5e default is 16 MiB; v7x physical VMEM is only 64 MiB per core).
    cap = 64 * 1024 * 1024
    try:
        cap = int(pltpu.get_tpu_info().vmem_capacity_bytes)
    except Exception:
        pass
    return int(max(32 * 1024 * 1024, min(cap * 3 // 4, 96 * 1024 * 1024)))


def _pick_tile(C, HP, W, x_elt_bytes, vmem_limit):
    # Double-buffered resident image block (pipeline allocates two buffers even
    # though its block index is constant within one batch element).
    resident = 2 * C * HP * W * x_elt_bytes
    avail = int(vmem_limit * 0.85) - resident
    if avail <= 0:
        return 128
    # Per-output-lane bytes: x-matmul result + y-weighted product (f32),
    # mx/my construction temporaries, double-buffered flow/out blocks.
    per_lane = (8 * C * HP            # tmp + product, f32
                + 12 * (W + HP)       # iota / select temps for mx, my
                + 2 * 2 * 4           # flow block, double-buffered
                + 3 * C * 4)          # out block (x2) + out tile, f32
    per_lane = int(per_lane * 1.5)    # headroom for compiler temporaries
    tn = (avail // per_lane // 128) * 128
    return int(max(128, min(1024, tn)))


def warp_tensors(x, flo, *, tn=None, use_bf16=True):
    """x: (B, C, H, W), flo: (B, 2, H, W)  ->  (B, C, H, W)."""
    B, C, H, W = x.shape
    HW = H * W
    HP = _round_up(H, 8)   # padded sample-row axis -> layout-trivial reshape
    mxu_dtype = jnp.bfloat16 if use_bf16 else jnp.float32
    x_elt = 2 if use_bf16 else jnp.dtype(x.dtype).itemsize

    xi = x if HP == H else jnp.pad(x, ((0, 0), (0, 0), (0, HP - H), (0, 0)))
    xf = xi.reshape(B, C * HP, W)
    if use_bf16:
        # Cast once in the wrapper: halves HBM->VMEM DMA and the resident VMEM
        # block, and removes the per-tile cast pass from the kernel.
        xf = xf.astype(jnp.bfloat16)
    ff = flo.reshape(B, 2, HW)

    vmem_limit = _vmem_limit_bytes()
    if tn is None:
        tn = _pick_tile(C, HP, W, x_elt, vmem_limit)
    tn = max(128, (tn // 128) * 128)
    tn = min(tn, _round_up(HW, 128))

    hw_pad = _round_up(HW, tn)
    if hw_pad != HW:
        # Padded output columns are sliced off below; their values are irrelevant.
        ff = jnp.pad(ff, ((0, 0), (0, 0), (0, hw_pad - HW)))
    num_tiles = hw_pad // tn

    kernel = functools.partial(_warp_kernel, C=C, H=H, HP=HP, W=W, TN=tn,
                               mxu_dtype=mxu_dtype)

    # Megacore: shard the batch axis when it splits evenly so each TensorCore
    # keeps a single resident image block; otherwise let either axis split.
    dimsem = ("parallel", "arbitrary") if B % 2 == 0 else ("parallel", "parallel")

    # TODO(synk): for very large pyramid levels where the resident (C*HP, W)
    # block or the O(C*HP*W*TN) x-matmul no longer fits the budget, add a
    # band-limited (W-chunked with displacement bounds) variant.
    out = pl.pallas_call(
        kernel,
        out_shape=jax.ShapeDtypeStruct((B, C, hw_pad), x.dtype),
        grid=(B, num_tiles),
        in_specs=[
            # Image block: same block index for every j -> stays VMEM-resident.
            pl.BlockSpec((None, C * HP, W), lambda b, j: (b, 0, 0)),
            # Flow block: lane-dense TN tile of output pixels.
            pl.BlockSpec((None, 2, tn), lambda b, j: (b, 0, j)),
        ],
        out_specs=pl.BlockSpec((None, C, tn), lambda b, j: (b, 0, j)),
        compiler_params=pltpu.CompilerParams(
            dimension_semantics=dimsem,
            vmem_limit_bytes=vmem_limit,
        ),
    )(xf, ff)
    return out[:, :, :HW].reshape(B, C, H, W)


def _ref_warp(x, flo):
    """Pure-JAX reference of the same semantics (sanity check)."""
    B, C, H, W = x.shape
    yy, xx = jnp.meshgrid(jnp.arange(H, dtype=jnp.float32),
                          jnp.arange(W, dtype=jnp.float32), indexing="ij")
    vx = xx[None] + flo[:, 0]
    vy = yy[None] + flo[:, 1]
    nx = 2.0 * vx / max(W - 1, 1) - 1.0
    ny = 2.0 * vy / max(H - 1, 1) - 1.0
    ix = ((nx + 1.0) * W - 1.0) * 0.5
    iy = ((ny + 1.0) * H - 1.0) * 0.5
    x0 = jnp.floor(ix); x1 = x0 + 1.0
    y0 = jnp.floor(iy); y1 = y0 + 1.0

    def sample(xc, yc):
        inb = (xc >= 0) & (xc <= W - 1) & (yc >= 0) & (yc <= H - 1)
        xi = jnp.clip(xc, 0, W - 1).astype(jnp.int32)
        yi = jnp.clip(yc, 0, H - 1).astype(jnp.int32)
        g = jax.vmap(lambda im, yb, xb: im[:, yb, xb])(x, yi, xi)  # (B,C,H,W)
        return jnp.where(inb[:, None], g, 0.0)

    w00 = (x1 - ix) * (y1 - iy); w10 = (ix - x0) * (y1 - iy)
    w01 = (x1 - ix) * (iy - y0); w11 = (ix - x0) * (iy - y0)
    return (sample(x0, y0) * w00[:, None] + sample(x1, y0) * w10[:, None]
            + sample(x0, y1) * w01[:, None] + sample(x1, y1) * w11[:, None])


if __name__ == "__main__":
    key = jax.random.PRNGKey(0)
    k1, k2, k3, k4, k5 = jax.random.split(key, 5)

    B, C, H, W = 2, 4, 16, 16
    x = jax.random.normal(k1, (B, C, H, W), dtype=jnp.float32)
    flo = 3.0 * jax.random.normal(k2, (B, 2, H, W), dtype=jnp.float32)

    ref = jax.block_until_ready(_ref_warp(x, flo))

    # Full-precision path: exact grid_sample semantics.
    out_f32 = jax.block_until_ready(warp_tensors(x, flo, use_bf16=False))
    assert out_f32.shape == (B, C, H, W)
    assert jnp.allclose(out_f32, ref, atol=1e-4, rtol=1e-4)

    # bf16-MXU fast path (image + x-interp matrix in bf16, f32 accumulation,
    # y-interp in f32).
    out_bf16 = jax.block_until_ready(warp_tensors(x, flo, use_bf16=True))
    assert jnp.allclose(out_bf16, ref, atol=5e-2, rtol=5e-2)

    # Multi-tile path (forces 2 lane tiles per image).
    out_tiled = jax.block_until_ready(warp_tensors(x, flo, tn=128, use_bf16=False))
    assert jnp.allclose(out_tiled, ref, atol=1e-4, rtol=1e-4)

    # Large flows: exercise out-of-bounds corners.
    flo_big = 10.0 * jax.random.normal(k3, (B, 2, H, W), dtype=jnp.float32)
    out_big = jax.block_until_ready(warp_tensors(x, flo_big, use_bf16=False))
    ref_big = jax.block_until_ready(_ref_warp(x, flo_big))
    assert jnp.allclose(out_big, ref_big, atol=1e-4, rtol=1e-4)

    # Non-multiple-of-8 rows, odd batch and flow-tail padding.
    B2, C2, H2, W2 = 1, 3, 10, 20
    x2 = jax.random.normal(k4, (B2, C2, H2, W2), dtype=jnp.float32)
    flo2 = 2.0 * jax.random.normal(k5, (B2, 2, H2, W2), dtype=jnp.float32)
    out2 = jax.block_until_ready(warp_tensors(x2, flo2, use_bf16=False))
    ref2 = jax.block_until_ready(_ref_warp(x2, flo2))
    assert jnp.allclose(out2, ref2, atol=1e-4, rtol=1e-4)

    print("KERNEL_OK")
</pallas_src>

<mosaic_0001>
module attributes {stable_mosaic.version = 11 : i64} {
  func.func @_warp_kernel(%arg0: i32, %arg1: i32, %arg2: memref<1x64x16xf32, #tpu.memory_space<vmem>>, %arg3: memref<1x2x256xf32, #tpu.memory_space<vmem>>, %arg4: memref<1x4x256xf32, #tpu.memory_space<vmem>>) attributes {dimension_semantics = [#tpu.dimension_semantics<parallel>, #tpu.dimension_semantics<arbitrary>], iteration_bounds = array<i64: 2, 1>, scalar_prefetch = 0 : i64, scratch_operands = 0 : i64, tpu.core_type = #tpu.core_type<tc>, window_params = [{transform_indices = @transform_0, window_bounds = array<i64: 1, 64, 16>}, {transform_indices = @transform_1, window_bounds = array<i64: 1, 2, 256>}, {transform_indices = @transform_2, window_bounds = array<i64: 1, 4, 256>}]} {
    %0 = tpu.iota {dimensions = array<i32: 1>} : vector<1x256xi32>
    %c256_i32 = arith.constant 256 : i32
    %1 = arith.muli %arg1, %c256_i32 : i32
    %2 = vector.broadcast %1 : i32 to vector<1x256xi32>
    %3 = arith.addi %2, %0 : vector<1x256xi32>
    %4 = arith.sitofp %3 : vector<1x256xi32> to vector<1x256xf32>
    %cst = arith.constant 1.600000e+01 : f32
    %5 = vector.broadcast %cst : f32 to vector<1x256xf32>
    %6 = arith.divf %4, %5 : vector<1x256xf32>
    %7 = math.floor %6 : vector<1x256xf32>
    %cst_0 = arith.constant 1.600000e+01 : f32
    %8 = vector.broadcast %cst_0 : f32 to vector<1x256xf32>
    %9 = arith.mulf %7, %8 : vector<1x256xf32>
    %10 = arith.subf %4, %9 : vector<1x256xf32>
    %c0 = arith.constant 0 : index
    %c0_1 = arith.constant 0 : index
    %c0_2 = arith.constant 0 : index
    %11 = vector.load %arg3[%c0, %c0_1, %c0_2] : memref<1x2x256xf32, #tpu.memory_space<vmem>>, vector<1x2x256xf32>
    %12 = vector.shape_cast %11 : vector<1x2x256xf32> to vector<2x256xf32>
    %13 = vector.extract_strided_slice %12 {offsets = [0, 0], sizes = [1, 256], strides = [1, 1]} : vector<2x256xf32> to vector<1x256xf32>
    %14 = arith.addf %10, %13 : vector<1x256xf32>
    %15 = vector.extract_strided_slice %12 {offsets = [1, 0], sizes = [1, 256], strides = [1, 1]} : vector<2x256xf32> to vector<1x256xf32>
    %16 = arith.addf %7, %15 : vector<1x256xf32>
    %cst_3 = arith.constant 2.000000e+00 : f32
    %17 = vector.broadcast %cst_3 : f32 to vector<1x256xf32>
    %18 = arith.mulf %17, %14 : vector<1x256xf32>
    %cst_4 = arith.constant 1.500000e+01 : f32
    %19 = vector.broadcast %cst_4 : f32 to vector<1x256xf32>
    %20 = arith.divf %18, %19 : vector<1x256xf32>
    %cst_5 = arith.constant 1.000000e+00 : f32
    %21 = vector.broadcast %cst_5 : f32 to vector<1x256xf32>
    %22 = arith.subf %20, %21 : vector<1x256xf32>
    %cst_6 = arith.constant 2.000000e+00 : f32
    %23 = vector.broadcast %cst_6 : f32 to vector<1x256xf32>
    %24 = arith.mulf %23, %16 : vector<1x256xf32>
    %cst_7 = arith.constant 1.500000e+01 : f32
    %25 = vector.broadcast %cst_7 : f32 to vector<1x256xf32>
    %26 = arith.divf %24, %25 : vector<1x256xf32>
    %cst_8 = arith.constant 1.000000e+00 : f32
    %27 = vector.broadcast %cst_8 : f32 to vector<1x256xf32>
    %28 = arith.subf %26, %27 : vector<1x256xf32>
    %cst_9 = arith.constant 1.000000e+00 : f32
    %29 = vector.broadcast %cst_9 : f32 to vector<1x256xf32>
    %30 = arith.addf %22, %29 : vector<1x256xf32>
    %cst_10 = arith.constant 1.600000e+01 : f32
    %31 = vector.broadcast %cst_10 : f32 to vector<1x256xf32>
    %32 = arith.mulf %30, %31 : vector<1x256xf32>
    %cst_11 = arith.constant 1.000000e+00 : f32
    %33 = vector.broadcast %cst_11 : f32 to vector<1x256xf32>
    %34 = arith.subf %32, %33 : vector<1x256xf32>
    %cst_12 = arith.constant 5.000000e-01 : f32
    %35 = vector.broadcast %cst_12 : f32 to vector<1x256xf32>
    %36 = arith.mulf %34, %35 : vector<1x256xf32>
    %cst_13 = arith.constant 1.000000e+00 : f32
    %37 = vector.broadcast %cst_13 : f32 to vector<1x256xf32>
    %38 = arith.addf %28, %37 : vector<1x256xf32>
    %cst_14 = arith.constant 1.600000e+01 : f32
    %39 = vector.broadcast %cst_14 : f32 to vector<1x256xf32>
    %40 = arith.mulf %38, %39 : vector<1x256xf32>
    %cst_15 = arith.constant 1.000000e+00 : f32
    %41 = vector.broadcast %cst_15 : f32 to vector<1x256xf32>
    %42 = arith.subf %40, %41 : vector<1x256xf32>
    %cst_16 = arith.constant 5.000000e-01 : f32
    %43 = vector.broadcast %cst_16 : f32 to vector<1x256xf32>
    %44 = arith.mulf %42, %43 : vector<1x256xf32>
    %45 = math.floor %36 : vector<1x256xf32>
    %46 = math.floor %44 : vector<1x256xf32>
    %47 = arith.subf %36, %45 : vector<1x256xf32>
    %cst_17 = arith.constant 1.000000e+00 : f32
    %48 = vector.broadcast %cst_17 : f32 to vector<1x256xf32>
    %49 = arith.subf %48, %47 : vector<1x256xf32>
    %50 = arith.subf %44, %46 : vector<1x256xf32>
    %cst_18 = arith.constant 1.000000e+00 : f32
    %51 = vector.broadcast %cst_18 : f32 to vector<1x256xf32>
    %52 = arith.subf %51, %50 : vector<1x256xf32>
    %cst_19 = arith.constant 1.000000e+00 : f32
    %53 = vector.broadcast %cst_19 : f32 to vector<1x256xf32>
    %54 = arith.addf %45, %53 : vector<1x256xf32>
    %cst_20 = arith.constant 1.000000e+00 : f32
    %55 = vector.broadcast %cst_20 : f32 to vector<1x256xf32>
    %56 = arith.addf %46, %55 : vector<1x256xf32>
    %cst_21 = arith.constant 0.000000e+00 : f32
    %57 = vector.broadcast %cst_21 : f32 to vector<1x256xf32>
    %58 = arith.cmpf oge, %45, %57 : vector<1x256xf32>
    %cst_22 = arith.constant 1.500000e+01 : f32
    %59 = vector.broadcast %cst_22 : f32 to vector<1x256xf32>
    %60 = arith.cmpf ole, %45, %59 : vector<1x256xf32>
    %61 = arith.andi %58, %60 : vector<1x256xi1>
    %cst_23 = arith.constant 0.000000e+00 : f32
    %62 = vector.broadcast %cst_23 : f32 to vector<1x256xf32>
    %63 = arith.select %61, %49, %62 : vector<1x256xi1>, vector<1x256xf32>
    %cst_24 = arith.constant 0.000000e+00 : f32
    %64 = vector.broadcast %cst_24 : f32 to vector<1x256xf32>
    %65 = arith.cmpf oge, %54, %64 : vector<1x256xf32>
    %cst_25 = arith.constant 1.500000e+01 : f32
    %66 = vector.broadcast %cst_25 : f32 to vector<1x256xf32>
    %67 = arith.cmpf ole, %54, %66 : vector<1x256xf32>
    %68 = arith.andi %65, %67 : vector<1x256xi1>
    %cst_26 = arith.constant 0.000000e+00 : f32
    %69 = vector.broadcast %cst_26 : f32 to vector<1x256xf32>
    %70 = arith.select %68, %47, %69 : vector<1x256xi1>, vector<1x256xf32>
    %cst_27 = arith.constant 0.000000e+00 : f32
    %71 = vector.broadcast %cst_27 : f32 to vector<1x256xf32>
    %72 = arith.cmpf oge, %46, %71 : vector<1x256xf32>
    %cst_28 = arith.constant 1.500000e+01 : f32
    %73 = vector.broadcast %cst_28 : f32 to vector<1x256xf32>
    %74 = arith.cmpf ole, %46, %73 : vector<1x256xf32>
    %75 = arith.andi %72, %74 : vector<1x256xi1>
    %cst_29 = arith.constant 0.000000e+00 : f32
    %76 = vector.broadcast %cst_29 : f32 to vector<1x256xf32>
    %77 = arith.select %75, %52, %76 : vector<1x256xi1>, vector<1x256xf32>
    %cst_30 = arith.constant 0.000000e+00 : f32
    %78 = vector.broadcast %cst_30 : f32 to vector<1x256xf32>
    %79 = arith.cmpf oge, %56, %78 : vector<1x256xf32>
    %cst_31 = arith.constant 1.500000e+01 : f32
    %80 = vector.broadcast %cst_31 : f32 to vector<1x256xf32>
    %81 = arith.cmpf ole, %56, %80 : vector<1x256xf32>
    %82 = arith.andi %79, %81 : vector<1x256xi1>
    %cst_32 = arith.constant 0.000000e+00 : f32
    %83 = vector.broadcast %cst_32 : f32 to vector<1x256xf32>
    %84 = arith.select %82, %50, %83 : vector<1x256xi1>, vector<1x256xf32>
    %85 = arith.fptosi %45 : vector<1x256xf32> to vector<1x256xi32>
    %86 = arith.fptosi %46 : vector<1x256xf32> to vector<1x256xi32>
    %c1_i32 = arith.constant 1 : i32
    %87 = vector.broadcast %c1_i32 : i32 to vector<1x256xi32>
    %88 = arith.addi %85, %87 : vector<1x256xi32>
    %c1_i32_33 = arith.constant 1 : i32
    %89 = vector.broadcast %c1_i32_33 : i32 to vector<1x256xi32>
    %90 = arith.addi %86, %89 : vector<1x256xi32>
    %91 = tpu.iota {dimensions = array<i32: 0>} : vector<16x256xi32>
    %92 = vector.broadcast %85 : vector<1x256xi32> to vector<16x256xi32>
    %93 = arith.cmpi eq, %91, %92 : vector<16x256xi32>
    %94 = vector.broadcast %88 : vector<1x256xi32> to vector<16x256xi32>
    %95 = arith.cmpi eq, %91, %94 : vector<16x256xi32>
    %cst_34 = arith.constant 0.000000e+00 : f32
    %96 = vector.shape_cast %70 : vector<1x256xf32> to vector<1x256xf32>
    %97 = vector.broadcast %96 : vector<1x256xf32> to vector<16x256xf32>
    %98 = vector.broadcast %cst_34 : f32 to vector<16x256xf32>
    %99 = arith.select %95, %97, %98 : vector<16x256xi1>, vector<16x256xf32>
    %100 = vector.shape_cast %63 : vector<1x256xf32> to vector<1x256xf32>
    %101 = vector.broadcast %100 : vector<1x256xf32> to vector<16x256xf32>
    %102 = arith.select %93, %101, %99 : vector<16x256xi1>, vector<16x256xf32>
    %103 = tpu.iota {dimensions = array<i32: 0>} : vector<16x256xi32>
    %104 = vector.broadcast %86 : vector<1x256xi32> to vector<16x256xi32>
    %105 = arith.cmpi eq, %103, %104 : vector<16x256xi32>
    %106 = vector.broadcast %90 : vector<1x256xi32> to vector<16x256xi32>
    %107 = arith.cmpi eq, %103, %106 : vector<16x256xi32>
    %cst_35 = arith.constant 0.000000e+00 : f32
    %108 = vector.shape_cast %84 : vector<1x256xf32> to vector<1x256xf32>
    %109 = vector.broadcast %108 : vector<1x256xf32> to vector<16x256xf32>
    %110 = vector.broadcast %cst_35 : f32 to vector<16x256xf32>
    %111 = arith.select %107, %109, %110 : vector<16x256xi1>, vector<16x256xf32>
    %112 = vector.shape_cast %77 : vector<1x256xf32> to vector<1x256xf32>
    %113 = vector.broadcast %112 : vector<1x256xf32> to vector<16x256xf32>
    %114 = arith.select %105, %113, %111 : vector<16x256xi1>, vector<16x256xf32>
    %c0_36 = arith.constant 0 : index
    %c0_37 = arith.constant 0 : index
    %c0_38 = arith.constant 0 : index
    %115 = vector.load %arg2[%c0_36, %c0_37, %c0_38] : memref<1x64x16xf32, #tpu.memory_space<vmem>>, vector<1x64x16xf32>
    %116 = vector.shape_cast %115 : vector<1x64x16xf32> to vector<64x16xf32>
    %cst_39 = arith.constant dense<0.000000e+00> : vector<64x256xf32>
    %117 = tpu.matmul %116, %102, %cst_39 {dimension_numbers = #tpu.dot_dimension_numbers<[1], [0], [0], [1], [0, 0, 1, 1], [], []>} : vector<64x16xf32>, vector<16x256xf32>, vector<64x256xf32> -> vector<64x256xf32>
    %118 = vector.shape_cast %117 : vector<64x256xf32> to vector<4x16x256xf32>
    %119 = vector.shape_cast %114 : vector<16x256xf32> to vector<1x16x256xf32>
    %120 = vector.broadcast %119 : vector<1x16x256xf32> to vector<4x16x256xf32>
    %121 = arith.mulf %118, %120 : vector<4x16x256xf32>
    %cst_40 = arith.constant dense<0.000000e+00> : vector<4x256xf32>
    %122 = vector.multi_reduction <add>, %121, %cst_40 [1] : vector<4x16x256xf32> to vector<4x256xf32>
    %c0_41 = arith.constant 0 : index
    %c0_42 = arith.constant 0 : index
    %c0_43 = arith.constant 0 : index
    %123 = vector.load %arg4[%c0_41, %c0_42, %c0_43] : memref<1x4x256xf32, #tpu.memory_space<vmem>>, vector<1x4x256xf32>
    %124 = vector.shape_cast %123 : vector<1x4x256xf32> to vector<4x256xf32>
    %125 = vector.shape_cast %122 : vector<4x256xf32> to vector<1x4x256xf32>
    tpu.vector_store %arg4[%c0_41, %c0_42, %c0_43], %125 {strides = array<i32>} : memref<1x4x256xf32, #tpu.memory_space<vmem>>, vector<1x4x256xf32>,
    return
  }
  func.func @transform_0(%arg0: i32, %arg1: i32) -> (i32, i32, i32) {
    %c0_i32 = arith.constant 0 : i32
    %c0_i32_0 = arith.constant 0 : i32
    %c0_i32_1 = arith.constant 0 : i32
    return %arg0, %c0_i32, %c0_i32_0 : i32, i32, i32
  }
  func.func @transform_1(%arg0: i32, %arg1: i32) -> (i32, i32, i32) {
    %c0_i32 = arith.constant 0 : i32
    %c0_i32_0 = arith.constant 0 : i32
    return %arg0, %c0_i32, %arg1 : i32, i32, i32
  }
  func.func @transform_2(%arg0: i32, %arg1: i32) -> (i32, i32, i32) {
    %c0_i32 = arith.constant 0 : i32
    %c0_i32_0 = arith.constant 0 : i32
    return %arg0, %c0_i32, %arg1 : i32, i32, i32
  }
}

</mosaic_0001>

<bundles_post_ra>
// kernel: tpu_custom_call.1
= control target key start
LH: loop header
LB: loop body
LE: loop exit
PB: predicated region body
PF: predicated region fallthrough
CT: control target
= control target key end

     0   :  { %7 = vsyncpa [#allocation3], 0  ;;  %s1185_s0 = inlined_call_operand.vmem [shape: f32[2,64,16], index: 0, kind: input, shape index: {}]   ;;  %s1186_s1 = inlined_call_operand.vmem [shape: f32[2,2,256], index: 1, kind: input, shape index: {}]   ;;  %s1187_s2 = inlined_call_operand.hbm [shape: f32[2,4,256], index: 2, kind: output, shape index: {}]  }
   0x1   :  { %9 = vsyncpa [#allocation3 + $0x1], 0  ;;  %s974_s9 = smov 0   ;;  %s976_s10 = smov 0  }
   0x2   :  { %s978_s11 = smov 0   ;;  %s980_s12 = smov 0  }
   0x3   :  { %s982_s13 = smov 0   ;;  %s984_s14 = smov 0  }
   0x4 LB: > { %s773_s15 = sadd.s32 4294967295, %s955_s14   ;;  %s774_s16 = sadd.s32 4294967294, %s955_s14   ;;  %s955_s14 = sphi %s984_s14, %s15_s14   ;;  %s951_s13 = sphi %s982_s13, %s1198_s13   ;;  %s947_s12 = sphi %s980_s12, %s1197_s12   ;;  %s943_s11 = sphi %s978_s11, %s1196_s11   ;;  %s939_s10 = sphi %s976_s10, %s1195_s10   ;;  %s935_s9 = sphi %s974_s9, %s1194_s9  }
   0x5   : > { %s27_s17 = sadd.s32 1, %s951_s13  ;;  %s90_s18 = sadd.s32 1, %s943_s11 }
   0x6   : > { %p29_p0 = scmp.ge.s32.totalorder %s27_s17, 2  ;;  %p100_p1 = scmp.ne.s32.totalorder %s943_s11, %s939_s10 }
   0x7   : > { %p101_p2 = scmp.eq.s32.totalorder %s773_s15, 1  ;;  %p106_p3 = scmp.ne.s32.totalorder %s939_s10, %s935_s9 }
   0x8   : > { %s1200_s17 = smov (%p29_p0, %s27_s17), 0  ;;  %p107_p5 = scmp.eq.s32.totalorder %s774_s16, 1 }
   0x9   : > { %p1014_p4 = por %p101_p2, %p100_p1  ;;  %s85_s20 = ssub.s32 %s951_s13, %s1200_s17 }
   0xa   : > { %p777_p6 = scmp.ge.s32.totalorder %s955_s14, 1  ;;  %p88_p7 = scmp.eq.s32.totalorder %s85_s20, 0 }
   0xb   : > { %p1021_p8 = por %p107_p5, %p106_p3  ;;  %p146_p9 = scmp.lt.s32.totalorder %s955_s14, 3 }
   0xc   : > { %s1027_s22 = scalar_select %p88_p7, %s943_s11, %s90_s18  }
   0xd   : > { %p147_p10 = pnand %p777_p6, %p146_p9 }
   0xe   : > { %p177_p11 = scmp.lt.s32.totalorder (!%p147_p10), %s947_s12, 1  ;;  %v193_v0 = vlaneseq (!%p147_p10)  ;;  %v957_v1 = vmov (!%p147_p10), 0.0   ;;  %s174_s4 = sand.u32 (!%p147_p10), 1, %s939_s10  }
   0xf   : > { %150 = sbr.rel (%p147_p10) target bundleno = 331 (0x14b), region = 28  ;;  %518 = vmatprep.mubr.f32.mxu0 (!%p147_p10), %v957_v1  ;;  %542 = vmatprep.mubr.f32.mxu1 (!%p147_p10), %v957_v1  ;;  %s778_s5 = sshll.u32 (!%p147_p10), %s174_s4, 3 }
  0x10   : > { %v194_v2 = vand.u32 (!%p147_p10), 127, %v193_v0  ;;  %v1035_v3 = vshrl.u32 (!%p147_p10), %v193_v0, 7  ;;  %s806_s6 = sshll.u32 (!%p147_p10), %s947_s12, 7  ;;  %s176_s7 = scalar_lea.vmem (!%p147_p10), [#allocation2], %s778_s5 }
  0x11   : > { %s685_s8 = sshll.u32 (!%p147_p10), %s176_s7, 4  ;;  %s1138_s18 = scalar_lea.hbm (!%p147_p10), %s1187_s2, %s806_s6  ;;  %s1140_s8 = int_to_ptr.vmem [resolvable:$true] %s685_s8 }
  0x12   : > { %v195_v4 = vadd.s32 (!%p147_p10), 128, %v194_v2  ;;  %v200_v5 = vcvt.s32.f32 (!%p147_p10), %v194_v2  ;;  %v1042_v7 = vsub.s32 (!%p147_p10), 0, %v1035_v3  ;;  %v219_v11 = vsub.s32 (!%p147_p10), 2, %v1035_v3  ;;  %s877_s20 = scalar_lea.vmem (!%p147_p10), %s1140_s8, 128 }
  0x13   : > { %v1069_v49 = vadd.s32 (!%p147_p10), 8, %v1035_v3  ;;  %p878_p12 = scmp.ne.s32.totalorder (!%p147_p10), %s1140_s8, %s877_s20 }
  0x14   : > { %v201_v6 = vcvt.s32.f32 (!%p147_p10), %v195_v4  ;;  %v1044_v8 = vmul.f32 (!%p147_p10), 0.0625, %v200_v5 }
  0x15   : > { %p879_p13 = pnand (!%p147_p10), %p878_p12, %p1014_p4 }
  0x16   : > { %s1033_s23 = scalar_select %p177_p11, %s947_s12, 1  ;;  %v1046_v9 = vmul.f32 0.0625, %v201_v6  ;;  %v205_v12 = vfloor.f32 %v1044_v8 }
  0x17   : > { %s669_s12 = scalar_lea.sflag [#allocation3], %s174_s4  ;;  %p880_p0 = pneg %p879_p13 }
  0x18   : > { %s805_s24 = sshll.u32 %s1033_s23, 2  ;;  %v206_v13 = vfloor.f32 %v1046_v9  ;;  %v207_v14 = vmul.f32 16.0, %v205_v12  ;;  %s804_s28 = sshll.u32 %s1033_s23, 6 }
  0x19   : > { %s190_s27 = scalar_lea.vmem %s1186_s1, %s805_s24  ;;  %s181_s3 = scalar_lea.vmem %s1185_s0, %s804_s28 }
  0x1a   : > { %v1048_v10 = vld [vmem:[%s190_s27] sm:$0xf]  ;;  %v208_v16 = vmul.f32 16.0, %v206_v13  ;;  %v209_v18 = vsub.f32 %v200_v5, %v207_v14  ;;  %s958_s23 = smov [#allocation2]  }
  0x1b   : > { %v216_v15 = vrot.slane %v1048_v10, %v1042_v7  ;;  %v220_v17 = vrot.slane %v1048_v10, %v219_v11  ;;  %s881_s24 = sshll.u32 %s958_s23, 4  ;;  %s882_s24 = int_to_ptr.vmem [resolvable:$false] %s881_s24 }
  0x1c   : > { %v210_v19 = vsub.f32 %v201_v6, %v208_v16  ;;  %s883_s25 = scalar_lea.vmem %s882_s24, 256  ;;  %p884_p1 = scmp.lt.s32.totalorder %s1140_s8, %s882_s24 }
  0x1d   : > { %v223_v20 = vadd.f32 %v216_v15, %v209_v18  ;;  %p885_p2 = scmp.lt.s32.totalorder %s883_s25, %s877_s20 }
  0x1e   : > { %v224_v21 = vadd.f32 %v220_v17, %v210_v19  ;;  %v421_v19 = vld [vmem:[%s181_s3] sm:$0xff] }
  0x1f   : > { %v237_v22 = vmul.f32 2.0, %v223_v20  ;;  %v425_v20 = vld [vmem:[%s181_s3 + $0x20] sm:$0xff]  ;;  %p886_p3 = por %p885_p2, %p884_p1 }
  0x20   : > { %v238_v23 = vmul.f32 2.0, %v224_v21  ;;  %v422_v21 = vld [vmem:[%s181_s3 + $0x8] sm:$0xff] }
  0x21   : > { %v240_v24 = vmul.f32 0.06666667, %v237_v22  ;;  %v426_v22 = vld [vmem:[%s181_s3 + $0x28] sm:$0xff]  ;;  %p887_p5 = pnand %p886_p3, %p880_p0 }
  0x22   : > { %v241_v25 = vmul.f32 0.06666667, %v238_v23  ;;  %v423_v23 = vld [vmem:[%s181_s3 + $0x10] sm:$0xff] }
  0x23   : > { %v783_v26 = vadd.f32 -1.0, %v240_v24  ;;  %v427_v24 = vld [vmem:[%s181_s3 + $0x30] sm:$0xff] }
  0x24   : > { %v784_v27 = vadd.f32 -1.0, %v241_v25  ;;  %v424_v25 = vld [vmem:[%s181_s3 + $0x18] sm:$0xff] }
  0x25   : > { %v250_v28 = vadd.f32 1.0, %v783_v26  ;;  %v428_v26 = vld [vmem:[%s181_s3 + $0x38] sm:$0xff] }
  0x26   : > { %v251_v29 = vadd.f32 1.0, %v784_v27  ;;  %v227_v27 = vsub.s32 1, %v1035_v3 }
  0x27   : > { %v252_v30 = vmul.f32 16.0, %v250_v28 }
  0x28   : > { %v253_v31 = vmul.f32 16.0, %v251_v29  ;;  %v228_v28 = vrot.slane %v1048_v10, %v227_v27  ;;  %v231_v29 = vsub.s32 3, %v1035_v3 }
  0x29   : > { %v787_v32 = vadd.f32 -1.0, %v252_v30 }
  0x2a   : > { %v788_v33 = vadd.f32 -1.0, %v253_v31  ;;  %v235_v30 = vadd.f32 %v228_v28, %v205_v12  ;;  %v232_v31 = vrot.slane %v1048_v10, %v231_v29 }
  0x2b   : > { %v256_v34 = vmul.f32 0.5, %v787_v32 }
  0x2c   : > { %v257_v35 = vmul.f32 0.5, %v788_v33  ;;  %v244_v32 = vmul.f32 2.0, %v235_v30 }
  0x2d   : > { %v266_v36 = vfloor.f32 %v256_v34 }
  0x2e   : > { %v267_v37 = vfloor.f32 %v257_v35  ;;  %v246_v33 = vmul.f32 0.06666667, %v244_v32 }
  0x2f   : > { %v270_v38 = vsub.f32 %v256_v34, %v266_v36  ;;  %v278_v39 = vadd.f32 1.0, %v266_v36  ;;  %vm282_vm0 = vcmp.ge.f32.partialorder %v266_v36, 0.0  ;;  %vm284_vm1 = vcmp.le.f32.partialorder %v266_v36, 15.0 }
  0x30   : > { %v271_v40 = vsub.f32 %v257_v35, %v267_v37  ;;  %v279_v41 = vadd.f32 1.0, %v267_v37  ;;  %vm283_vm2 = vcmp.ge.f32.partialorder %v267_v37, 0.0  ;;  %vm285_vm3 = vcmp.le.f32.partialorder %v267_v37, 15.0  ;;  %vm1060_vm4 = vmand %vm282_vm0, %vm284_vm1 }
  0x31   : > { %vm287_vm5 = vmand %vm283_vm2, %vm285_vm3  ;;  %v815_v43 = vtrunc.f32 %v267_v37  ;;  %v272_v44 = vsub.f32 1.0, %v270_v38  ;;  %vm290_vm6 = vcmp.ge.f32.partialorder %v278_v39, 0.0  ;;  %vm292_vm7 = vcmp.le.f32.partialorder %v278_v39, 15.0 }
  0x32   : > { %v273_v45 = vsub.f32 1.0, %v271_v40  ;;  %vm291_vm8 = vcmp.ge.f32.partialorder %v279_v41, 0.0  ;;  %vm293_vm9 = vcmp.le.f32.partialorder %v279_v41, 15.0  ;;  %vm1064_vm10 = vmand %vm290_vm6, %vm292_vm7  ;;  %v813_v47 = vtrunc.f32 %v266_v36 }
  0x33   : > { %vm295_vm11 = vmand %vm291_vm8, %vm293_vm9  ;;  %v816_v48 = vcvt.f32.s32 %v815_v43  ;;  %v296_v52 = vsel %vm1064_vm10, %v270_v38, 0.0  ;;  %v288_v56 = vsel %vm1060_vm4, %v272_v44, 0.0  ;;  %vm429_vm4 = vcmask 130048  }
  0x34   : > { %v289_v50 = vsel %vm287_vm5, %v273_v45, 0.0  ;;  %v297_v51 = vsel %vm295_vm11, %v271_v40, 0.0  ;;  %v814_v53 = vcvt.f32.s32 %v813_v47  ;;  %v352_v62 = vrot.slane %v296_v52, %v1042_v7 }
  0x35   : > { %v319_v54 = vadd.s32 1, %v816_v48  ;;  %v332_v55 = vrot.slane %v816_v48, %v1042_v7  ;;  %v356_v57 = vrot.slane %v297_v51, %v1042_v7  ;;  %v368_v61 = vrot.slane %v289_v50, %v1042_v7 }
  0x36   : > { %v318_v58 = vadd.s32 1, %v814_v53  ;;  %v328_v59 = vrot.slane %v814_v53, %v1042_v7  ;;  %v364_v0 = vrot.slane %v288_v56, %v1042_v7  ;;  %v785_v35 = vadd.f32 -1.0, %v246_v33 }
  0x37   : > { %v344_v60 = vrot.slane %v319_v54, %v1042_v7  ;;  %vm334_vm12 = vcmp.eq.s32.totalorder %v1035_v3, %v332_v55  ;;  %vm336_vm13 = vcmp.eq.s32.totalorder %v1069_v49, %v332_v55 }
  0x38   : > { %v340_v63 = vrot.slane %v318_v58, %v1042_v7  ;;  %vm333_vm0 = vcmp.eq.s32.totalorder %v1035_v3, %v328_v59  ;;  %vm335_vm1 = vcmp.eq.s32.totalorder %v1069_v49, %v328_v59  ;;  %v258_v37 = vadd.f32 1.0, %v785_v35 }
  0x39   : > { %vm346_vm14 = vcmp.eq.s32.totalorder %v1035_v3, %v344_v60  ;;  %vm348_vm15 = vcmp.eq.s32.totalorder %v1069_v49, %v344_v60 }
  0x3a   : > { %v358_v2 = vsel %vm346_vm14, %v356_v57, 0.0  ;;  %v360_v4 = vsel %vm348_vm15, %v356_v57, 0.0  ;;  %vm345_vm2 = vcmp.eq.s32.totalorder %v1035_v3, %v340_v63  ;;  %vm347_vm3 = vcmp.eq.s32.totalorder %v1069_v49, %v340_v63 }
  0x3b   : > { %v370_v5 = vsel %vm334_vm12, %v368_v61, %v358_v2  ;;  %v372_v6 = vsel %vm336_vm13, %v368_v61, %v360_v4  ;;  %v357_v11 = vsel %vm345_vm2, %v352_v62, 0.0  ;;  %v359_v14 = vsel %vm347_vm3, %v352_v62, 0.0 }
  0x3c   : > { %v807_v15 = vpack.c.bf16 %v372_v6, %v370_v5  ;;  %v369_v16 = vsel %vm333_vm0, %v364_v0, %v357_v11  ;;  %v371_v17 = vsel %vm335_vm1, %v364_v0, %v359_v14  ;;  %v260_v39 = vmul.f32 16.0, %v258_v37 }
  0x3d   : > { %v809_v18 = vpack.c.bf16 %v371_v17, %v369_v16 }
  0x3e   : > { %808 = vmatprep.subr.bf16.mxu0 %v807_v15  ;;  %811 = vmatprep.subr.bf16.mxu1 %v807_v15  ;;  %v789_v41 = vadd.f32 -1.0, %v260_v39 }
  0x3f   : > { %810 = vmatpush1.bf16.msra.mxu0 %v809_v18  ;;  %812 = vmatpush1.bf16.msra.mxu1 %v809_v18 }
  0x40   : > { %v264_v43 = vmul.f32 0.5, %v789_v41 }
  0x42   : > { %791 = vmatmul.mubr.msk.f32.vlgmr.msra.gmra.mrb[0].mxu0 %vm429_vm4, %v421_v19  ;;  %795 = vmatmul.mubr.msk.f32.vlgmr.msra.gmra.mrb[0].mxu1 %vm429_vm4, %v425_v20  ;;  %v268_v8 = vfloor.f32 %v264_v43 }
  0x43   : > { %524 = vmatprep.mubr.f32.mxu0 %v957_v1  ;;  %548 = vmatprep.mubr.f32.mxu1 %v957_v1 }
  0x44   : > { %v817_v45 = vtrunc.f32 %v268_v8  ;;  %v280_v46 = vadd.f32 1.0, %v268_v8  ;;  %vm298_vm7 = vcmp.ge.f32.partialorder %v268_v8, 0.0  ;;  %vm300_vm8 = vcmp.le.f32.partialorder %v268_v8, 15.0 }
  0x45   : > { %vm302_vm12 = vmand %vm298_vm7, %vm300_vm8 }
  0x46   : > { %792 = vmatmul.mubr.msk.f32.gmra.mrb[2].mxu0 %vm429_vm4, %v422_v21  ;;  %796 = vmatmul.mubr.msk.f32.gmra.mrb[2].mxu1 %vm429_vm4, %v426_v22  ;;  %v818_v47 = vcvt.f32.s32 %v817_v45  ;;  %vm306_vm5 = vcmp.ge.f32.partialorder %v280_v46, 0.0  ;;  %vm308_vm6 = vcmp.le.f32.partialorder %v280_v46, 15.0 }
  0x47   : > { %530 = vmatprep.mubr.f32.mxu0 %v957_v1  ;;  %554 = vmatprep.mubr.f32.mxu1 %v957_v1  ;;  %vm310_vm9 = vmand %vm306_vm5, %vm308_vm6 }
  0x48   : > { %v320_v50 = vadd.s32 1, %v818_v47  ;;  %v376_v58 = vrot.slane %v818_v47, %v1042_v7 }
  0x4a   : > { %793 = vmatmul.mubr.msk.f32.gmra.mrb[4].mxu0 %vm429_vm4, %v423_v23  ;;  %797 = vmatmul.mubr.msk.f32.gmra.mrb[4].mxu1 %vm429_vm4, %v427_v24  ;;  %v388_v54 = vrot.slane %v320_v50, %v1042_v7  ;;  %vm381_vm2 = vcmp.eq.s32.totalorder %v1035_v3, %v376_v58  ;;  %vm383_vm6 = vcmp.eq.s32.totalorder %v1069_v49, %v376_v58 }
  0x4b   : > { %536 = vmatprep.mubr.f32.mxu0 %v957_v1  ;;  %560 = vmatprep.mubr.f32.mxu1 %v957_v1  ;;  %v236_v1 = vadd.f32 %v232_v31, %v206_v13  ;;  %v274_v13 = vsub.f32 %v264_v43, %v268_v8 }
  0x4c   : > { %vm393_vm0 = vcmp.eq.s32.totalorder %v1035_v3, %v388_v54  ;;  %vm395_vm3 = vcmp.eq.s32.totalorder %v1069_v49, %v388_v54 }
  0x4d   : > { %v245_v34 = vmul.f32 2.0, %v236_v1  ;;  %v276_v52 = vsub.f32 1.0, %v274_v13  ;;  %v312_v53 = vsel %vm310_vm9, %v274_v13, 0.0  ;;  %vm652_vm9 = vcmask 1041409  }
  0x4e   : > { %794 = vmatmul.mubr.msk.f32.gmra.mrb[6].mxu0 %vm429_vm4, %v424_v25  ;;  %798 = vmatmul.mubr.msk.f32.gmra.mrb[6].mxu1 %vm429_vm4, %v428_v26  ;;  %v400_v59 = vrot.slane %v312_v53, %v1042_v7 }
  0x4f   : > { %v247_v36 = vmul.f32 0.06666667, %v245_v34  ;;  %v304_v57 = vsel %vm302_vm12, %v276_v52, 0.0  ;;  %vm659_vm12 = vcmask 1046534  }
  0x50   : > { %v412_v63 = vrot.slane %v304_v57, %v1042_v7  ;;  %v405_v0 = vsel %vm393_vm0, %v400_v59, 0.0  ;;  %v407_v14 = vsel %vm395_vm3, %v400_v59, 0.0 }
  0x51   : > { %v786_v38 = vadd.f32 -1.0, %v247_v36 }
  0x52   : > { %v417_v6 = vsel %vm381_vm2, %v412_v63, %v405_v0  ;;  %v419_v23 = vsel %vm383_vm6, %v412_v63, %v407_v14 }
  0x53   : > { %v259_v40 = vadd.f32 1.0, %v786_v38 }
  0x55   : > { %v261_v42 = vmul.f32 16.0, %v259_v40 }
  0x57   : > { %v790_v44 = vadd.f32 -1.0, %v261_v42 }
  0x59   : > { %v265_v12 = vmul.f32 0.5, %v790_v44 }
  0x5b   : > { %v269_v10 = vfloor.f32 %v265_v12 }
  0x5d   : > { %v819_v9 = vtrunc.f32 %v269_v10  ;;  %v281_v48 = vadd.f32 1.0, %v269_v10  ;;  %v275_v55 = vsub.f32 %v265_v12, %v269_v10  ;;  %vm299_vm13 = vcmp.ge.f32.partialorder %v269_v10, 0.0 }
  0x5e   : > { %vm301_vm14 = vcmp.le.f32.partialorder %v269_v10, 15.0 }
  0x5f   : > { %v820_v51 = vcvt.f32.s32 %v819_v9  ;;  %vm307_vm10 = vcmp.ge.f32.partialorder %v281_v48, 0.0  ;;  %vm309_vm11 = vcmp.le.f32.partialorder %v281_v48, 15.0  ;;  %v277_v60 = vsub.f32 1.0, %v275_v55  ;;  %vm303_vm1 = vmand %vm299_vm13, %vm301_vm14 }
  0x60   : > { %vm311_vm15 = vmand %vm307_vm10, %vm309_vm11  ;;  %vm654_vm10 = vcmask 1045509   ;;  %vm657_vm11 = vcmask 1042434   ;;  %vm662_vm13 = vcmask 1043459   ;;  %vm664_vm14 = vcmask 1047559  }
  0x61   : > { %v321_v56 = vadd.s32 1, %v820_v51  ;;  %v313_v61 = vsel %vm311_vm15, %v275_v55, 0.0  ;;  %v305_v2 = vsel %vm303_vm1, %v277_v60, 0.0  ;;  %v380_v4 = vrot.slane %v820_v51, %v1042_v7 }
  0x62   : > { %v404_v5 = vrot.slane %v313_v61, %v1042_v7  ;;  %v416_v11 = vrot.slane %v305_v2, %v1042_v7 }
  0x63   : > { %v392_v62 = vrot.slane %v321_v56, %v1042_v7  ;;  %vm382_vm7 = vcmp.eq.s32.totalorder %v1035_v3, %v380_v4  ;;  %vm384_vm8 = vcmp.eq.s32.totalorder %v1069_v49, %v380_v4 }
  0x65   : > { %vm394_vm4 = vcmp.eq.s32.totalorder %v1035_v3, %v392_v62  ;;  %vm396_vm5 = vcmp.eq.s32.totalorder %v1069_v49, %v392_v62 }
  0x66   : > { %v406_v16 = vsel %vm394_vm4, %v404_v5, 0.0  ;;  %v408_v18 = vsel %vm396_vm5, %v404_v5, 0.0 }
  0x67   : > { %v418_v24 = vsel %vm382_vm7, %v416_v11, %v406_v16  ;;  %v420_v25 = vsel %vm384_vm8, %v416_v11, %v408_v18 }
 0x115   : > { %v520_v15 = vpop.f32.mrb[0].mxu0  ;;  %v544_v17 = vpop.f32.mrb[0].mxu1 }
 0x116   : > { %v567_v19 = vmul.f32 %v520_v15, %v417_v6  ;;  %v522_v20 = vpop.f32.mrb[1].mxu0  ;;  %v575_v21 = vmul.f32 %v544_v17, %v417_v6  ;;  %v546_v22 = vpop.f32.mrb[1].mxu1 }
 0x117   : > { %v576_v26 = vmul.f32 %v546_v22, %v418_v24  ;;  %v568_v3 = vmul.f32 %v522_v20, %v418_v24 }
 0x119   : > { %v526_v7 = vpop.f32.mrb[2].mxu0  ;;  %v550_v27 = vpop.f32.mrb[2].mxu1 }
 0x11a   : > { %v569_v28 = vmul.f32 %v526_v7, %v419_v23  ;;  %v577_v29 = vmul.f32 %v550_v27, %v419_v23  ;;  %v528_v30 = vpop.f32.mrb[3].mxu0  ;;  %v552_v31 = vpop.f32.mrb[3].mxu1 }
 0x11b   : > { %v570_v32 = vmul.f32 %v528_v30, %v420_v25  ;;  %v578_v1 = vmul.f32 %v552_v31, %v420_v25 }
 0x11c   : > { %v583_v33 = vadd.f32 %v569_v28, %v567_v19  ;;  %v611_v49 = vadd.f32 %v577_v29, %v575_v21 }
 0x11d   : > { %v590_v34 = vadd.f32 %v570_v32, %v568_v3  ;;  %v618_v35 = vadd.f32 %v578_v1, %v576_v26  ;;  %v532_v36 = vpop.f32.mrb[4].mxu0  ;;  %v556_v37 = vpop.f32.mrb[4].mxu1 }
 0x11e   : > { %v584_v38 = vrot.slane %v583_v33, 4  ;;  %v612_v39 = vrot.slane %v611_v49, 4  ;;  %v571_v40 = vmul.f32 %v532_v36, %v417_v6  ;;  %v534_v41 = vpop.f32.mrb[5].mxu0  ;;  %v579_v42 = vmul.f32 %v556_v37, %v417_v6  ;;  %v558_v43 = vpop.f32.mrb[5].mxu1 }
 0x11f   : > { %v591_v44 = vrot.slane %v590_v34, 4  ;;  %v619_v8 = vrot.slane %v618_v35, 4  ;;  %v572_v47 = vmul.f32 %v534_v41, %v418_v24  ;;  %v580_v9 = vmul.f32 %v558_v43, %v418_v24 }
 0x120   : > { %v585_v12 = vadd.f32 %v584_v38, %v583_v33  ;;  %v613_v45 = vadd.f32 %v612_v39, %v611_v49 }
 0x121   : > { %v592_v10 = vadd.f32 %v591_v44, %v590_v34  ;;  %v620_v46 = vadd.f32 %v619_v8, %v618_v35  ;;  %v538_v13 = vpop.f32.mrb[6].mxu0  ;;  %v562_v48 = vpop.f32.mrb[6].mxu1 }
 0x122   : > { %v586_v50 = vrot.slane %v585_v12, 2  ;;  %v614_v51 = vrot.slane %v613_v45, 2  ;;  %v573_v52 = vmul.f32 %v538_v13, %v419_v23  ;;  %v581_v53 = vmul.f32 %v562_v48, %v419_v23  ;;  %v540_v54 = vpop.f32.mrb[7].mxu0  ;;  %v564_v55 = vpop.f32.mrb[7].mxu1 }
 0x123   : > { %v593_v56 = vrot.slane %v592_v10, 2  ;;  %v621_v57 = vrot.slane %v620_v46, 2  ;;  %v574_v58 = vmul.f32 %v540_v54, %v420_v25  ;;  %v582_v59 = vmul.f32 %v564_v55, %v420_v25 }
 0x124   : > { %v587_v60 = vadd.f32 %v586_v50, %v585_v12  ;;  %v615_v61 = vadd.f32 %v614_v51, %v613_v45  ;;  %v597_v62 = vadd.f32 %v573_v52, %v571_v40  ;;  %v625_v63 = vadd.f32 %v581_v53, %v579_v42 }
 0x125   : > { %v594_v0 = vadd.f32 %v593_v56, %v592_v10  ;;  %v622_v2 = vadd.f32 %v621_v57, %v620_v46  ;;  %v604_v4 = vadd.f32 %v574_v58, %v572_v47  ;;  %v632_v5 = vadd.f32 %v582_v59, %v580_v9 }
 0x126   : > { %v588_v6 = vrot.slane %v587_v60, 1  ;;  %v616_v11 = vrot.slane %v615_v61, 1  ;;  %v598_v14 = vrot.slane %v597_v62, 4  ;;  %v626_v15 = vrot.slane %v625_v63, 4 }
 0x127   : > { %v595_v16 = vrot.slane %v594_v0, 1  ;;  %v623_v17 = vrot.slane %v622_v2, 1  ;;  %v605_v18 = vrot.slane %v604_v4, 4  ;;  %v633_v19 = vrot.slane %v632_v5, 4 }
 0x128   : > { %v589_v20 = vadd.f32 %v588_v6, %v587_v60  ;;  %v617_v21 = vadd.f32 %v616_v11, %v615_v61  ;;  %v599_v22 = vadd.f32 %v598_v14, %v597_v62  ;;  %v627_v23 = vadd.f32 %v626_v15, %v625_v63 }
 0x129   : > { %v596_v24 = vadd.f32 %v595_v16, %v594_v0  ;;  %v624_v25 = vadd.f32 %v623_v17, %v622_v2  ;;  %v606_v26 = vadd.f32 %v605_v18, %v604_v4  ;;  %v634_v7 = vadd.f32 %v633_v19, %v632_v5 }
 0x12a   : > { %v600_v27 = vrot.slane %v599_v22, 2  ;;  %v628_v28 = vrot.slane %v627_v23, 2 }
 0x12b   : > { %v647_v29 = vcombine.low %v589_v20, %v596_v24  ;;  %v649_v30 = vcombine.low %v617_v21, %v624_v25  ;;  %v607_v31 = vrot.slane %v606_v26, 2  ;;  %v635_v3 = vrot.slane %v634_v7, 2 }
 0x12c   : > { %v601_v32 = vadd.f32 %v600_v27, %v599_v22  ;;  %v629_v1 = vadd.f32 %v628_v28, %v627_v23 }
 0x12d   : > { %v608_v33 = vadd.f32 %v607_v31, %v606_v26  ;;  %v636_v49 = vadd.f32 %v635_v3, %v634_v7  ;;  %v656_v8 = vrot.slane %v649_v30, 6 }
 0x12e   : > { %v602_v34 = vrot.slane %v601_v32, 1  ;;  %v630_v35 = vrot.slane %v629_v1, 1 }
 0x12f   : > { %v609_v36 = vrot.slane %v608_v33, 1  ;;  %v637_v37 = vrot.slane %v636_v49, 1 }
 0x130   : > { %v603_v38 = vadd.f32 %v602_v34, %v601_v32  ;;  %v631_v39 = vadd.f32 %v630_v35, %v629_v1 }
 0x131   : > { %v610_v40 = vadd.f32 %v609_v36, %v608_v33  ;;  %v638_v41 = vadd.f32 %v637_v37, %v636_v49 }
 0x133   : > { %v648_v42 = vcombine.low %v603_v38, %v610_v40  ;;  %v650_v43 = vcombine.low %v631_v39, %v638_v41 }
 0x135   : > { %v651_v44 = vrot.slane %v648_v42, 7  ;;  %v661_v46 = vrot.slane %v650_v43, 5 }
 0x137   : > { %v653_v12 = vsel %vm652_vm9, %v651_v44, %v647_v29 }
 0x138   : > { %v655_v45 = vsel %vm654_vm10, %v651_v44, %v653_v12 }
 0x139   : > { %v658_v10 = vsel %vm657_vm11, %v656_v8, %v655_v45 }
 0x13a   : > { %v660_v47 = vsel %vm659_vm12, %v656_v8, %v658_v10 }
 0x13b   : > { %v663_v9 = vsel %vm662_vm13, %v661_v46, %v660_v47 }
 0x13c   : > { %v665_v13 = vsel %vm664_vm14, %v661_v46, %v663_v9 }
 0x13d   : > { %667 = vst [vmem:[%s176_s7] sm:$0xff] %v665_v13 }
 0x13e   : > { %890 = shalt.err (!%p887_p5)
}
 0x13f   : > { %s891_s26 = scalar_lea.hbm %s1138_s18, 128  ;;  %s895_s29 = scalar_lea.hbm %s1187_s2, 256 }
 0x140   : > { %p892_p6 = scmp.ne.s32.totalorder %s1138_s18, %s891_s26  ;;  %p896_p10 = scmp.lt.u32.totalorder %s1138_s18, %s1187_s2 }
 0x141   : > { %p897_p11 = scmp.lt.u32.totalorder %s895_s29, %s891_s26  ;;  %p899_p13 = scmp.lt.u32.totalorder %s891_s26, %s1138_s18 }
 0x142   : > { %p893_p7 = pnand %p892_p6, %p1014_p4 }
 0x143   : > { %p898_p12 = por %p897_p11, %p896_p10 }
 0x144   : > { %p894_p9 = pneg %p893_p7 }
 0x145   : > { %p900_p0 = por %p899_p13, %p898_p12 }
 0x147   : > { %p901_p1 = pnand %p900_p0, %p894_p9 }
 0x149   : > { %904 = shalt.err (!%p901_p1)
}
 0x14a   : > { %821 = dma.vmem_to_hbm [thread:$0]  (%p1014_p4), %s1140_s8, 128, %s1138_s18, %s669_s12  }
 0x14b PF: > { %p827_p2 = scmp.ge.s32.totalorder %s955_s14, 2  ;;  %s697_s4 = sand.u32 1, %s935_s9  }
 0x14c   : > { %s698_s5 = scalar_lea.sflag [#allocation3], %s697_s4 }
 0x14d   : > { %p824_p3 = pnand %p827_p2, %p1021_p8 }
 0x14f   : > { %930 = dma.done.wait (!%p824_p3), %s698_s5, 128  }
 0x150   : > { %932 = vsyncadd (!%p824_p3), %s698_s5, 4294967168  ;;  %s15_s14 = sadd.s32 1, %s955_s14   ;;  %s1194_s9 = smov %s939_s10 }
 0x151   : > { %p12_p5 = scmp.ge.s32.totalorder %s15_s14, 4   ;;  %s1195_s10 = smov %s943_s11 }
 0x152   : > { %s1196_s11 = smov %s1027_s22  ;;  %s1197_s12 = smov %s951_s13 }
 0x153   : > { %s1198_s13 = smov %s1200_s17  ;;  %14 = sbr.rel (!%p12_p5) target bundleno = 4 (0x4), region = 66 }
 0x15a   :  { %703 = vsyncpa [#allocation3], 1 }
 0x15b   :  { %705 = vsyncpa [#allocation3 + $0x1], 1 }

</bundles_post_ra>
